<compile_context>
chip_gen: v5e
topology: v5e:2x2
jax: 0.10.0
libtpu: 0.0.40
codegen_flags: <defaults>
</compile_context>

<pallas_src>
import jax
import jax.numpy as jnp
from jax.experimental import pallas as pl
from jax.experimental.pallas import tpu as pltpu

LANES = 128
_ROW_ALIGN = 32                 # covers packed-sublane alignment for f32/bf16/int8/fp8
_MIN_PALLAS_BYTES = 1 << 20     # below ~1 MiB, launch overhead dominates -> use fused XLA


def _h_wish_kernel(x_ref, o_ref):
    x = x_ref[...]
    # h_sigmoid(x) = relu6(x + 3) / 6 ; h_wish(x) = x * h_sigmoid(x)
    hsig = jnp.clip(x + 3.0, 0.0, 6.0) * (1.0 / 6.0)
    o_ref[...] = (x * hsig).astype(o_ref.dtype)


def _h_wish_jnp(x):
    return x * (jnp.clip(x + 3.0, 0.0, 6.0) * (1.0 / 6.0))


def _round_up(n, m):
    return ((n + m - 1) // m) * m


def _cdiv(a, b):
    return (a + b - 1) // b


def _vmem_capacity_bytes():
    """Best-effort physical VMEM capacity; conservative (v7x-sized) fallback."""
    try:
        cap = int(pltpu.get_tpu_info().vmem_capacity_bytes)
        if cap > 0:
            return cap
    except Exception:
        pass
    return 64 * 1024 * 1024


def _num_tensorcores():
    """Best-effort TensorCores-per-chip (v7x has 2; v5e/v6e have 1)."""
    try:
        kind = str(jax.local_devices()[0].device_kind).lower()
        if "v7" in kind:
            return 2
    except Exception:
        pass
    return 1


def h_wish(x, *, block_bytes=None, min_pallas_bytes=_MIN_PALLAS_BYTES):
    """Elementwise hard-swish on an arbitrary-shape (e.g. NCHW) tensor."""
    orig_shape = x.shape
    itemsize = jnp.dtype(x.dtype).itemsize
    total = x.size
    nbytes = total * itemsize

    # Fast path 1: tiny tensors -- custom-call launch/grid overhead dominates
    # and XLA fuses the elementwise op at the HBM roofline anyway.
    # Fast path 2: ragged totals (total % 128 != 0) -- any Pallas route needs
    # either a whole-array pad/slice or a concat of a jnp-computed tail, i.e.
    # at least one extra full HBM pass; the fused XLA elementwise is already
    # at the 1-read + 1-write roofline, so it is strictly better here.
    if total == 0 or nbytes < min_pallas_bytes or total % LANES != 0:
        return _h_wish_jnp(x)

    rows = total // LANES
    x2d = x.reshape(rows, LANES)    # lane-dense slab; reshape is free

    # --- generation-aware block sizing -------------------------------------
    # Pipelined VMEM footprint is 4x block (2 input + 2 output buffers):
    #   v5e/v6e : 128 MiB physical VMEM -> 12 MiB blocks (48 MiB pipelined)
    #   v7x     :  64 MiB physical VMEM ->  8 MiB blocks (32 MiB pipelined)
    big_vmem = _vmem_capacity_bytes() >= 100 * 1024 * 1024
    if block_bytes is None:
        block_bytes = (12 << 20) if big_vmem else (8 << 20)
    vmem_limit = min(
        (96 << 20) if big_vmem else (48 << 20),
        max(32 << 20, 4 * block_bytes + (8 << 20)),
    )

    tile_rows = max(
        _ROW_ALIGN,
        (block_bytes // (LANES * itemsize)) // _ROW_ALIGN * _ROW_ALIGN,
    )
    tile_rows = min(tile_rows, _round_up(rows, _ROW_ALIGN))
    num_steps = _cdiv(rows, tile_rows)

    # Megacore split (v7x only): give the "parallel" axis >=2 steps per
    # TensorCore so each core keeps DMA prefetch/writeback overlapped.  On
    # single-TC chips a forced split only shrinks blocks, so skip it.
    n_tc = _num_tensorcores()
    if n_tc > 1:
        min_steps = 2 * n_tc
        if num_steps < min_steps and rows >= min_steps * _ROW_ALIGN:
            tile_rows = max(_ROW_ALIGN, _round_up(_cdiv(rows, min_steps), _ROW_ALIGN))
            num_steps = _cdiv(rows, tile_rows)

    out2d = pl.pallas_call(
        _h_wish_kernel,
        out_shape=jax.ShapeDtypeStruct((rows, LANES), x.dtype),
        grid_spec=pltpu.PrefetchScalarGridSpec(
            num_scalar_prefetch=0,
            grid=(num_steps,),
            in_specs=[pl.BlockSpec((tile_rows, LANES), lambda i: (i, 0))],
            out_specs=pl.BlockSpec((tile_rows, LANES), lambda i: (i, 0)),
        ),
        compiler_params=pltpu.CompilerParams(
            dimension_semantics=("parallel",),
            vmem_limit_bytes=vmem_limit,
        ),
        # No input_output_aliases: without caller-side donation XLA inserts a
        # defensive full copy of x, i.e. a whole extra HBM pass.
    )(x2d)

    return out2d.reshape(orig_shape)


if __name__ == "__main__":
    # Canonical small NCHW input from the spec.  Force the Pallas path (the
    # default policy would route a tensor this small to the jnp fast path).
    x = jax.random.normal(jax.random.PRNGKey(0), (2, 4, 16, 16), dtype=jnp.float32) * 4.0
    y = jax.block_until_ready(h_wish(x, min_pallas_bytes=0))
    assert y.shape == x.shape and y.dtype == x.dtype
    assert jnp.allclose(y, _h_wish_jnp(x), atol=1e-6, rtol=1e-6)

    # Same input through the default policy (fused-XLA fast path).
    y_fast = jax.block_until_ready(h_wish(x))
    assert jnp.allclose(y_fast, _h_wish_jnp(x), atol=1e-6, rtol=1e-6)

    # A larger tensor that takes the Pallas path by default; force a small
    # block so the grid has several steps and a masked partial last block
    # (rows = 2304, tile_rows = 320 -> 8 steps, 64-row tail).
    x2 = jax.random.normal(jax.random.PRNGKey(1), (2, 24, 64, 96), dtype=jnp.float32) * 4.0
    y2 = jax.block_until_ready(h_wish(x2, block_bytes=160 * 1024))
    assert y2.shape == x2.shape
    assert jnp.allclose(y2, _h_wish_jnp(x2), atol=1e-6, rtol=1e-6)

    # Ragged total (not a multiple of 128): handled by the fused-XLA path.
    x3 = jax.random.normal(jax.random.PRNGKey(2), (3, 5, 7, 11), dtype=jnp.float32) * 4.0
    y3 = jax.block_until_ready(h_wish(x3))
    assert y3.shape == x3.shape
    assert jnp.allclose(y3, _h_wish_jnp(x3), atol=1e-6, rtol=1e-6)

    print("KERNEL_OK")
</pallas_src>

<mosaic_0001>
module attributes {stable_mosaic.version = 11 : i64} {
  func.func @_h_wish_kernel(%arg0: i32, %arg1: memref<32x128xf32, #tpu.memory_space<vmem>>, %arg2: memref<32x128xf32, #tpu.memory_space<vmem>>) attributes {dimension_semantics = [#tpu.dimension_semantics<parallel>], iteration_bounds = array<i64: 1>, scalar_prefetch = 0 : i64, scratch_operands = 0 : i64, tpu.core_type = #tpu.core_type<tc>, window_params = [{transform_indices = @transform_0, window_bounds = array<i64: 32, 128>}, {transform_indices = @transform_1, window_bounds = array<i64: 32, 128>}]} {
    %c0 = arith.constant 0 : index
    %c0_0 = arith.constant 0 : index
    %0 = vector.load %arg1[%c0, %c0_0] : memref<32x128xf32, #tpu.memory_space<vmem>>, vector<32x128xf32>
    %cst = arith.constant 3.000000e+00 : f32
    %1 = vector.broadcast %cst : f32 to vector<32x128xf32>
    %2 = arith.addf %0, %1 : vector<32x128xf32>
    %cst_1 = arith.constant 0.000000e+00 : f32
    %cst_2 = arith.constant 6.000000e+00 : f32
    %3 = vector.broadcast %cst_1 : f32 to vector<32x128xf32>
    %4 = arith.maximumf %3, %2 : vector<32x128xf32>
    %5 = vector.broadcast %cst_2 : f32 to vector<32x128xf32>
    %6 = arith.minimumf %5, %4 : vector<32x128xf32>
    %cst_3 = arith.constant 0.166666672 : f32
    %7 = vector.broadcast %cst_3 : f32 to vector<32x128xf32>
    %8 = arith.mulf %6, %7 : vector<32x128xf32>
    %9 = arith.mulf %0, %8 : vector<32x128xf32>
    %c0_4 = arith.constant 0 : index
    %c0_5 = arith.constant 0 : index
    %10 = vector.load %arg2[%c0_4, %c0_5] : memref<32x128xf32, #tpu.memory_space<vmem>>, vector<32x128xf32>
    tpu.vector_store %arg2[%c0_4, %c0_5], %9 {strides = array<i32>} : memref<32x128xf32, #tpu.memory_space<vmem>>, vector<32x128xf32>,
    return
  }
  func.func @transform_0(%arg0: i32) -> (i32, i32) {
    %c0_i32 = arith.constant 0 : i32
    %c0_i32_0 = arith.constant 0 : i32
    return %arg0, %c0_i32 : i32, i32
  }
  func.func @transform_1(%arg0: i32) -> (i32, i32) {
    %c0_i32 = arith.constant 0 : i32
    %c0_i32_0 = arith.constant 0 : i32
    return %arg0, %c0_i32 : i32, i32
  }
}

</mosaic_0001>

<bundles_post_ra>
// kernel: tpu_custom_call.1
= control target key start
LH: loop header
LB: loop body
LE: loop exit
PB: predicated region body
PF: predicated region fallthrough
CT: control target
= control target key end

     0   :  { %6 = vsyncpa [#allocation3], 0  ;;  %s154_s0 = inlined_call_operand.hbm [shape: f32[16,128], index: 0, kind: input, shape index: {}]   ;;  %s155_s1 = inlined_call_operand.hbm [shape: f32[16,128], index: 1, kind: output, shape index: {}]  }
   0x1   :  { %7 = vsyncpa [#allocation4], 0 }
   0x2   :  { %11 = vsyncadd [#allocation3], 256  ;;  %s12_s8 = sshll.u32 %s154_s0, 4  ;;  %s128_s9 = smov [#allocation2]   ;;  %s13_s8 = int_to_ptr.hbm [resolvable:$true] %s12_s8 }
   0x3   :  { %s14_s10 = sshll.u32 %s128_s9, 4  ;;  %s129_s11 = smov 128   ;;  %s15_s10 = int_to_ptr.vmem [resolvable:$true] %s14_s10 }
   0x4   :  { %s130_s12 = smov 8  }
   0x5   :  { %20 = dma.hbm_to_vmem [thread:$0]  %s13_s8, 256, %s15_s10, [#allocation3], %s129_s11, %s129_s11, %s130_s12  }
   0x6   :  { %124 = dma.done.wait [#allocation3], 512  }
   0x7   :  { %125 = vsyncadd [#allocation3], 4294966784  ;;  %v25_v0 = vld [vmem:[#allocation2] sm:$0xff]  ;;  %v26_v1 = vld [vmem:[#allocation2 + $0x8] sm:$0xff] }
   0x8   :  { %v27_v2 = vld [vmem:[#allocation2 + $0x10] sm:$0xff]  ;;  %v29_v3 = vadd.f32 3.0, %v25_v0  ;;  %v30_v4 = vadd.f32 3.0, %v26_v1  ;;  %v28_v6 = vld [vmem:[#allocation2 + $0x18] sm:$0xff] }
   0x9   :  { %v31_v5 = vadd.f32 3.0, %v27_v2  ;;  %v32_v7 = vadd.f32 3.0, %v28_v6 }
   0xa   :  { %v33_v8 = vmax.f32 %v29_v3, 0.0  ;;  %v34_v9 = vmax.f32 %v30_v4, 0.0 }
   0xb   :  { %v35_v10 = vmax.f32 %v31_v5, 0.0  ;;  %v36_v11 = vmax.f32 %v32_v7, 0.0 }
   0xc   :  { %v37_v12 = vmin.f32 %v33_v8, 6.0  ;;  %v38_v13 = vmin.f32 %v34_v9, 6.0 }
   0xd   :  { %v39_v14 = vmin.f32 %v35_v10, 6.0  ;;  %v40_v15 = vmin.f32 %v36_v11, 6.0 }
   0xe   :  { %v41_v16 = vmul.f32 0.16666667, %v37_v12  ;;  %v42_v17 = vmul.f32 0.16666667, %v38_v13 }
   0xf   :  { %v43_v18 = vmul.f32 0.16666667, %v39_v14  ;;  %v44_v19 = vmul.f32 0.16666667, %v40_v15 }
  0x10   :  { %v45_v20 = vmul.f32 %v41_v16, %v25_v0  ;;  %v46_v21 = vmul.f32 %v42_v17, %v26_v1 }
  0x11   :  { %v47_v22 = vmul.f32 %v43_v18, %v27_v2  ;;  %v48_v23 = vmul.f32 %v44_v19, %v28_v6 }
  0x12   :  { %49 = vst [vmem:[#allocation5] sm:$0xff] %v45_v20 }
  0x13   :  { %50 = vst [vmem:[#allocation5 + $0x8] sm:$0xff] %v46_v21 }
  0x14   :  { %51 = vst [vmem:[#allocation5 + $0x10] sm:$0xff] %v47_v22 }
  0x15   :  { %52 = vst [vmem:[#allocation5 + $0x18] sm:$0xff] %v48_v23 }
  0x16   :  { %56 = vsyncadd [#allocation4], 256  ;;  %s59_s14 = sshll.u32 %s155_s1, 4  ;;  %s131_s15 = smov [#allocation5]   ;;  %s60_s14 = int_to_ptr.hbm [resolvable:$true] %s59_s14 }
  0x17   :  { %s57_s16 = sshll.u32 %s131_s15, 4  ;;  %s58_s16 = int_to_ptr.vmem [resolvable:$true] %s57_s16 }
  0x18   :  { %65 = dma.vmem_to_hbm [thread:$0]  %s58_s16, 256, %s60_s14, [#allocation4], %s129_s11, %s129_s11, %s130_s12  }
  0x19   :  { %126 = dma.done.wait [#allocation4], 512  }
  0x1a   :  { %127 = vsyncadd [#allocation4], 4294966784 }
  0x1b   :  { %70 = vsyncpa [#allocation3], 1 }
  0x1c   :  { %71 = vsyncpa [#allocation4], 1 }

</bundles_post_ra>
